<compile_context>
chip_gen: v7x
topology: tpu7x:2x2x1
jax: 0.10.0
libtpu: 0.0.40
codegen_flags: <defaults>
</compile_context>

<pallas_src>
import jax
import jax.numpy as jnp
from jax.experimental import pallas as pl
from jax.experimental.pallas import tpu as pltpu


# ----------------------------------------------------------------------- kernel
def _add_pe_kernel(x_ref, pe_ref, o_ref):
    # x_ref : (TB, TC) tile of the flattened (B*H, S*D) input
    # pe_ref: (1,  TC) tile of the flattened (1, S*D) positional-encoding table
    # o_ref : (TB, TC) output tile (aliased onto x in HBM when donated)
    o_ref[...] = x_ref[...] + pe_ref[...]


# --------------------------------------------------------------- tiling heuristics
def _default_block_bytes() -> int:
    """Per-tile DMA budget.  v5e's slower HBM already hides the ~0.35us per-step
    overhead at 4 MiB blocks; v6e/v7x want ~8 MiB (4 double-buffered tiles plus
    the PE row is ~36 MiB, comfortably under v7x's 64 MiB physical VMEM)."""
    try:
        kind = jax.devices()[0].device_kind.lower()
    except Exception:
        return 8 << 20
    if "v5e" in kind or "v5 lite" in kind or "v5lite" in kind:
        return 4 << 20
    return 8 << 20


def _pick_tiles(BH: int, SD: int, itemsize: int, budget: int):
    """Pick (TB, TC, grid_rows, grid_cols) for the flattened (BH, SD) slab.

    Constraints honoured:
      * TC is a multiple of 128 (lane width) or the full SD extent.
      * TB is a multiple of the dtype's sublane packing (8 f32 / 16 bf16 /
        32 int8) or the full BH extent.
      * block bytes <= budget whenever a legal smaller block exists (ragged
        last blocks via cdiv grids are fine -- Pallas masks them).
      * tensors > 4 MiB always get >= 2 grid steps so v7x's two TensorCores
        can both be used.
    """
    row_align = max(8, 32 // itemsize)                 # sublane packing per dtype
    budget = max(budget, row_align * 128 * itemsize)   # never below one legal tile

    # ---- lane (last-dim) chunk -------------------------------------------------
    if SD % 128 == 0:
        max_tc = max(128, (budget // (row_align * itemsize)) // 128 * 128)
        TC = min(SD, max_tc)
    else:
        TC = SD            # full extent is always a legal block dim

    # ---- sublane (row) chunk ---------------------------------------------------
    max_tb = max(1, budget // (TC * itemsize))
    if max_tb >= BH or BH <= row_align:
        TB = BH            # whole row extent in one block
    else:
        TB = max(row_align, (max_tb // row_align) * row_align)

    grid_rows = pl.cdiv(BH, TB)
    grid_cols = pl.cdiv(SD, TC)

    # Guarantee >= 2 grid steps on tensors worth sharding across v7x's 2 TCs.
    if grid_rows * grid_cols == 1 and BH * SD * itemsize > (4 << 20):
        if BH > row_align:
            TB = max(row_align, pl.cdiv(pl.cdiv(BH, 2), row_align) * row_align)
            grid_rows = pl.cdiv(BH, TB)
        elif SD % 128 == 0 and TC % 256 == 0:
            TC //= 2
            grid_cols = pl.cdiv(SD, TC)

    return TB, TC, grid_rows, grid_cols


# ---------------------------------------------------------------------- wrapper
def positional_encoder(x: jax.Array,
                       head_dim: int,
                       base: float = 100000.0,
                       position_ids=None,
                       target_block_bytes=None) -> jax.Array:
    """Additive sinusoidal positional encoding.  x: (bsz, num_heads, seq_len, head_dim)."""
    if head_dim % 2 != 0:
        raise ValueError(f"`head_dim`:{head_dim} must be even")
    B, H, S, D = x.shape
    if D != head_dim:
        raise ValueError(f"last dim of x ({D}) must equal head_dim ({head_dim})")
    if target_block_bytes is None:
        target_block_bytes = _default_block_bytes()

    # ---- PE table: computed ONCE, float32 math, cast only the final table -------
    if position_ids is None:
        pos = jnp.arange(0, S, 1, dtype=jnp.float32)
    else:
        pos = jnp.asarray(position_ids, dtype=jnp.float32).reshape(-1)
        if pos.shape[0] != S:
            # A per-batch (B, S) position_ids would break the shared (1, S*D) table.
            raise ValueError("position_ids must be a 1-D vector of length seq_len")
    div_term = jnp.power(
        jnp.float32(base),
        jnp.arange(0, D, 2, dtype=jnp.float32) / jnp.float32(D))        # (D/2,)
    angles = pos.reshape(-1, 1) / div_term                              # (S, D/2)
    # interleave: pe[..., 0::2] = cos, pe[..., 1::2] = sin
    pe = jnp.stack([jnp.cos(angles), jnp.sin(angles)], axis=-1)         # (S, D/2, 2)
    pe = pe.reshape(S, D).astype(x.dtype).reshape(1, S * D)             # lane-dense row

    # ---- lane-dense 2-D view of x ------------------------------------------------
    BH, SD = B * H, S * D
    x2 = x.reshape(BH, SD)                                              # contiguous, free
    itemsize = jnp.dtype(x.dtype).itemsize

    TB, TC, grid_rows, grid_cols = _pick_tiles(BH, SD, itemsize, target_block_bytes)

    # Double-buffered x + out tiles, double-buffered PE row, plus headroom.
    vmem_limit = int(4 * TB * TC * itemsize + 2 * TC * itemsize + (4 << 20))

    cost = pl.CostEstimate(
        flops=BH * SD,
        transcendentals=0,
        bytes_accessed=2 * BH * SD * itemsize + SD * itemsize)

    out2 = pl.pallas_call(
        _add_pe_kernel,
        out_shape=jax.ShapeDtypeStruct((BH, SD), x.dtype),
        grid_spec=pltpu.PrefetchScalarGridSpec(
            num_scalar_prefetch=0,
            # SD-chunk axis outermost / BH-row axis innermost: the PE tile's
            # block index is constant across the inner loop, so the small PE
            # row is not re-DMA'd every grid step.
            grid=(grid_cols, grid_rows),
            in_specs=[
                pl.BlockSpec((TB, TC), lambda j, i: (i, j)),   # x tile
                pl.BlockSpec((1, TC), lambda j, i: (0, j)),    # shared PE row
            ],
            out_specs=pl.BlockSpec((TB, TC), lambda j, i: (i, j)),
        ),
        compiler_params=pltpu.CompilerParams(
            dimension_semantics=("parallel", "parallel"),
            vmem_limit_bytes=vmem_limit,
        ),
        input_output_aliases={0: 0},   # in-place add when the caller donates x
        cost_estimate=cost,
    )(x2, pe)

    return out2.reshape(B, H, S, D)


# -------------------------------------------------------------------- reference
def _reference(x, head_dim, base=100000.0):
    # Pure-JAX reference mirroring the PyTorch forward exactly (pe in x.dtype).
    S = x.shape[-2]
    pos = jnp.arange(0, S, 1, dtype=x.dtype)
    div_term = jnp.power(jnp.asarray(base, x.dtype),
                         jnp.arange(0, head_dim, 2, dtype=x.dtype) / head_dim)
    angles = pos.reshape(-1, 1) / div_term            # (S, D/2)
    pe = jnp.zeros_like(x)
    pe = pe.at[..., 0::2].add(jnp.cos(angles))
    pe = pe.at[..., 1::2].add(jnp.sin(angles))
    return x + pe


if __name__ == "__main__":
    key = jax.random.PRNGKey(0)

    # Test 1: the module's natural small shape (bsz, num_heads, seq_len, head_dim).
    B, H, S, D = 2, 4, 8, 32
    x = jax.random.normal(key, (B, H, S, D), dtype=jnp.float32)
    out = jax.block_until_ready(positional_encoder(x, head_dim=D, base=100000.0))
    ref = _reference(x, head_dim=D, base=100000.0)
    assert out.shape == x.shape and out.dtype == x.dtype
    assert jnp.allclose(out, ref, atol=1e-5, rtol=1e-5), float(jnp.max(jnp.abs(out - ref)))

    # Test 2: force a multi-block grid on BOTH axes (exercises both index maps,
    # the shared-PE outer axis and the hardened tile picker) with a tiny budget.
    B2, H2, S2, D2 = 2, 8, 16, 128
    x2 = jax.random.normal(jax.random.PRNGKey(0), (B2, H2, S2, D2), dtype=jnp.float32)
    out2 = jax.block_until_ready(
        positional_encoder(x2, head_dim=D2, base=100000.0, target_block_bytes=8192))
    ref2 = _reference(x2, head_dim=D2, base=100000.0)
    assert jnp.allclose(out2, ref2, atol=1e-5, rtol=1e-5), float(jnp.max(jnp.abs(out2 - ref2)))

    # Test 3: bf16 input (exercises the 16-row sublane-packing path).  The kernel
    # builds the PE table in float32 and casts once, so compare against an f32
    # reference with bf16-level tolerance.
    x3 = jax.random.normal(jax.random.PRNGKey(1), (2, 8, 16, 64), dtype=jnp.bfloat16)
    out3 = jax.block_until_ready(positional_encoder(x3, head_dim=64, base=100000.0))
    ref3 = _reference(x3.astype(jnp.float32), head_dim=64, base=100000.0)
    assert out3.dtype == jnp.bfloat16
    assert jnp.allclose(out3.astype(jnp.float32), ref3, atol=5e-2, rtol=5e-2), \
        float(jnp.max(jnp.abs(out3.astype(jnp.float32) - ref3)))

    print("KERNEL_OK")
</pallas_src>

<mosaic_0001>
module attributes {stable_mosaic.version = 11 : i64} {
  func.func @_add_pe_kernel(%arg0: i32, %arg1: i32, %arg2: memref<8x256xf32, #tpu.memory_space<vmem>>, %arg3: memref<1x256xf32, #tpu.memory_space<vmem>>, %arg4: memref<8x256xf32, #tpu.memory_space<vmem>>) attributes {dimension_semantics = [#tpu.dimension_semantics<parallel>, #tpu.dimension_semantics<parallel>], iteration_bounds = array<i64: 1, 1>, scalar_prefetch = 0 : i64, scratch_operands = 0 : i64, tpu.core_type = #tpu.core_type<tc>, window_params = [{transform_indices = @transform_0, window_bounds = array<i64: 8, 256>}, {transform_indices = @transform_1, window_bounds = array<i64: 1, 256>}, {transform_indices = @transform_2, window_bounds = array<i64: 8, 256>}]} {
    %c0 = arith.constant 0 : index
    %c0_0 = arith.constant 0 : index
    %0 = vector.load %arg2[%c0, %c0_0] : memref<8x256xf32, #tpu.memory_space<vmem>>, vector<8x256xf32>
    %c0_1 = arith.constant 0 : index
    %c0_2 = arith.constant 0 : index
    %1 = vector.load %arg3[%c0_1, %c0_2] : memref<1x256xf32, #tpu.memory_space<vmem>>, vector<1x256xf32>
    %2 = vector.broadcast %1 : vector<1x256xf32> to vector<8x256xf32>
    %3 = arith.addf %0, %2 : vector<8x256xf32>
    %c0_3 = arith.constant 0 : index
    %c0_4 = arith.constant 0 : index
    %4 = vector.load %arg4[%c0_3, %c0_4] : memref<8x256xf32, #tpu.memory_space<vmem>>, vector<8x256xf32>
    tpu.vector_store %arg4[%c0_3, %c0_4], %3 {strides = array<i32>} : memref<8x256xf32, #tpu.memory_space<vmem>>, vector<8x256xf32>,
    return
  }
  func.func @transform_0(%arg0: i32, %arg1: i32) -> (i32, i32) {
    %c0_i32 = arith.constant 0 : i32
    return %arg1, %arg0 : i32, i32
  }
  func.func @transform_1(%arg0: i32, %arg1: i32) -> (i32, i32) {
    %c0_i32 = arith.constant 0 : i32
    %c0_i32_0 = arith.constant 0 : i32
    return %c0_i32, %arg0 : i32, i32
  }
  func.func @transform_2(%arg0: i32, %arg1: i32) -> (i32, i32) {
    %c0_i32 = arith.constant 0 : i32
    return %arg1, %arg0 : i32, i32
  }
}

</mosaic_0001>

<bundles_post_ra>
// kernel: tpu_custom_call.1
= control target key start
LH: loop header
LB: loop body
LE: loop exit
PB: predicated region body
PF: predicated region fallthrough
CT: control target
= control target key end

     0   :  { %7 = vsyncpa [#allocation3], 0  ;;  %s151_s0 = inlined_call_operand.hbm [shape: f32[8,256], index: 0, kind: input, shape index: {}, may-alias: {0,2}]   ;;  %s152_s1 = inlined_call_operand.vmem [shape: f32[1,256], index: 1, kind: input, shape index: {}]   ;;  %s153_s2 = inlined_call_operand.hbm [shape: f32[8,256], index: 2, kind: output, shape index: {}, may-alias: {0,2}]  }
   0x1   :  { %8 = vsyncpa [#allocation4], 0  ;;  %s107_s9 = smov [#allocation2]   ;;  %s59_s13 = scalar_lea.hbm %s151_s0, 256 }
   0x2   :  { %s15_s10 = sshll.u32 %s107_s9, 4  ;;  %p60_p0 = scmp.ne.s32.totalorder %s151_s0, %s59_s13  ;;  %s16_s10 = int_to_ptr.vmem [resolvable:$true] %s15_s10 }
   0x3   :  { %p63_p1 = scmp.lt.u32.totalorder %s59_s13, %s151_s0 }
   0x5   :  { %p65_p2 = pnand %p63_p1, %p60_p0 }
   0x7   :  { %68 = shalt.err (!%p65_p2)
}
   0x8   :  { %s69_s18 = scalar_lea.vmem %s16_s10, 256  ;;  %p74_p4 = scmp.lt.s32.totalorder %s16_s10, %s16_s10 }
   0x9   :  { %p70_p3 = scmp.ne.s32.totalorder %s16_s10, %s69_s18  ;;  %p75_p5 = scmp.lt.s32.totalorder %s69_s18, %s69_s18 }
   0xb   :  { %p76_p6 = por %p75_p5, %p74_p4 }
   0xd   :  { %p77_p7 = pnand %p76_p6, %p70_p3 }
   0xf   :  { %80 = shalt.err (!%p77_p7)
}
  0x10   :  { %18 = dma.hbm_to_vmem [thread:$0]  %s151_s0, 256, %s16_s10, [#allocation3]  }
  0x11   :  { %103 = dma.done.wait [#allocation3], 256  }
  0x12   :  { %104 = vsyncadd [#allocation3], 4294967040  ;;  %v28_v0 = vlaneseq  ;;  %v24_v4 = vld [vmem:[#allocation2] sm:$0xff]  ;;  %v25_v6 = vld [vmem:[#allocation2 + $0x8] sm:$0xff]  ;;  %s108_s23 = smov [#allocation5]  }
  0x13   :  { %v26_v5 = vld [vmem:[%s152_s1] sm:$0x3]  ;;  %s48_s24 = sshll.u32 %s108_s23, 4  ;;  %s49_s24 = int_to_ptr.vmem [resolvable:$true] %s48_s24 }
  0x14   :  { %v29_v1 = vshrl.u32 %v28_v0, 7  ;;  %s81_s0 = scalar_lea.vmem %s49_s24, 256  ;;  %p86_p9 = scmp.lt.s32.totalorder %s49_s24, %s49_s24 }
  0x15   :  { %p82_p8 = scmp.ne.s32.totalorder %s49_s24, %s81_s0  ;;  %p87_p10 = scmp.lt.s32.totalorder %s81_s0, %s81_s0 }
  0x16   :  { %v30_v2 = vsub.s32 0, %v29_v1  ;;  %v34_v3 = vsub.s32 1, %v29_v1 }
  0x17   :  { %p88_p11 = por %p87_p10, %p86_p9 }
  0x18   :  { %v31_v7 = vrot.slane %v26_v5, %v30_v2  ;;  %v35_v8 = vrot.slane %v26_v5, %v34_v3 }
  0x19   :  { %p89_p12 = pnand %p88_p11, %p82_p8 }
  0x1a   :  { %v38_v9 = vadd.f32 %v31_v7, %v24_v4  ;;  %v39_v10 = vadd.f32 %v35_v8, %v25_v6 }
  0x1c   :  { %40 = vst [vmem:[#allocation5] sm:$0xff] %v38_v9  ;;  %41 = vst [vmem:[#allocation5 + $0x8] sm:$0xff] %v39_v10 }
  0x1d   :  { %92 = shalt.err (!%p89_p12)
}
  0x1e   :  { %s93_s1 = scalar_lea.hbm %s153_s2, 256 }
  0x1f   :  { %p94_p13 = scmp.ne.s32.totalorder %s153_s2, %s93_s1  ;;  %p97_p0 = scmp.lt.u32.totalorder %s93_s1, %s153_s2 }
  0x21   :  { %p99_p1 = pnand %p97_p0, %p94_p13 }
  0x23   :  { %102 = shalt.err (!%p99_p1)
}
  0x24   :  { %51 = dma.vmem_to_hbm [thread:$0]  %s49_s24, 256, %s153_s2, [#allocation4]  }
  0x25   :  { %105 = dma.done.wait [#allocation4], 256  }
  0x26   :  { %106 = vsyncadd [#allocation4], 4294967040 }
  0x27   :  { %55 = vsyncpa [#allocation3], 1 }
  0x28   :  { %56 = vsyncpa [#allocation4], 1 }

</bundles_post_ra>
